<compile_context>
chip_gen: v6e
topology: v6e:2x2x1
jax: 0.10.0
libtpu: 0.0.40
codegen_flags: <defaults>
</compile_context>

<pallas_src>
import functools

import jax
import jax.numpy as jnp
from jax.experimental import pallas as pl
from jax.experimental.pallas import tpu as pltpu

_LANE = 128
_SUBLANE = 8

# murmur3 fmix32 / golden-ratio constants, expressed as signed int32.
_GOLDEN = 0x9E3779B9 - (1 << 32)   # -1640531527
_C1 = 0x85EBCA6B - (1 << 32)       # -2048144789
_C2 = 0xC2B2AE35 - (1 << 32)       # -1028477387


def _masking_kernel(seed_ref, x_ref, o_ref, *, block_rows, threshold):
    """Randomly zero elements of one (block_rows, 128) block.

    seed_ref: SMEM (1,) int32 seed (scalar prefetch)
    x_ref:    VMEM (block_rows, 128) input block (native dtype)
    o_ref:    VMEM (block_rows, 128) output block
    """
    shp = x_ref.shape
    row0 = pl.program_id(0) * block_rows
    rows_i = jax.lax.broadcasted_iota(jnp.int32, shp, 0) + row0
    lane_i = jax.lax.broadcasted_iota(jnp.int32, shp, 1)
    # Unique global element index (wraps mod 2^32 for huge tensors; that is
    # fine -- it is only a hash input).
    idx = rows_i * jnp.int32(_LANE) + lane_i

    # Counter-based hash: Weyl step then murmur3 fmix32 finalizer.  Logical
    # right shifts are emulated as arithmetic shift + low-bit mask so that
    # everything stays in plain int32 ops (TPU + interpret safe).
    h = idx * jnp.int32(_GOLDEN) + seed_ref[0]
    h = h ^ ((h >> 16) & jnp.int32(0x0000FFFF))
    h = h * jnp.int32(_C1)
    h = h ^ ((h >> 13) & jnp.int32(0x0007FFFF))
    h = h * jnp.int32(_C2)
    h = h ^ ((h >> 16) & jnp.int32(0x0000FFFF))

    # h is uniform over all 32-bit patterns; signed compare against a
    # precomputed threshold gives P(keep) = 1 - mask_ratio.
    keep = h >= jnp.int32(threshold)
    x = x_ref[...]
    o_ref[...] = jnp.where(keep, x, jnp.zeros_like(x))


def _round_up(a, b):
    return ((a + b - 1) // b) * b


def masking_pallas(x, mask_ratio=0.5, seed=0, block_rows=None, donate_input=False):
    """Equivalent of MaskingLayer(mask_ratio)(x): zero each element w.p. mask_ratio."""
    orig_shape = x.shape
    dtype = x.dtype
    n = x.size
    if n == 0:
        return x
    if mask_ratio >= 1.0:
        # torch: rand > 1.0 is never true -> everything masked.
        return jnp.zeros_like(x)

    itemsize = jnp.dtype(dtype).itemsize
    # Packed-sublane tiling: 8 rows for 4-byte, 16 for 2-byte, 32 for 1-byte.
    sub = max(_SUBLANE, 32 // max(itemsize, 1))

    rows = pl.cdiv(n, _LANE)
    xf = jnp.ravel(x)
    pad = rows * _LANE - n
    if pad:
        # Only pad to a lane multiple (< 128 extra elements); the ragged last
        # row-block (if any) is masked by Pallas, no block-granularity padding.
        xf = jnp.pad(xf, (0, pad))
    x2 = xf.reshape(rows, _LANE)

    if block_rows is None:
        # ~2 MiB per block buffer (4096 rows for f32).
        block_rows = max(sub, (2 * 1024 * 1024) // (_LANE * itemsize))
    block_rows = max(sub, _round_up(block_rows, sub))
    if rows <= sub:
        # Single block equal to the full array extent (allowed even if < sub).
        block_rows = rows
    else:
        # Ensure at least two grid blocks so v7x's two TensorCores can both
        # work on the "parallel" axis; no-op cost on v5e/v6e.
        block_rows = min(block_rows, _round_up(pl.cdiv(rows, 2), sub))
    num_blocks = pl.cdiv(rows, block_rows)

    # keep  <=>  h >= threshold  with  P(keep) = 1 - mask_ratio.
    threshold = int(round(float(mask_ratio) * 4294967296.0)) - 2147483648
    threshold = max(-2147483648, min(threshold, 2147483647))

    kernel = functools.partial(
        _masking_kernel, block_rows=block_rows, threshold=threshold
    )
    seed_arr = jnp.asarray([seed], dtype=jnp.int32)

    out2 = pl.pallas_call(
        kernel,
        out_shape=jax.ShapeDtypeStruct((rows, _LANE), dtype),
        grid_spec=pltpu.PrefetchScalarGridSpec(
            num_scalar_prefetch=1,
            grid=(num_blocks,),
            in_specs=[
                pl.BlockSpec((block_rows, _LANE), lambda i, seed: (i, 0)),
            ],
            out_specs=pl.BlockSpec((block_rows, _LANE), lambda i, seed: (i, 0)),
        ),
        compiler_params=pltpu.CompilerParams(
            dimension_semantics=("parallel",),
        ),
        input_output_aliases=({1: 0} if donate_input else {}),
    )(seed_arr, x2)

    out = out2.reshape(-1)
    if pad:
        out = out[:n]
    return out.reshape(orig_shape)


if __name__ == "__main__":
    key = jax.random.PRNGKey(0)
    # Small NCHW-style input consistent with how the layer is used in the model.
    x = jax.random.normal(key, (2, 4, 16, 16), jnp.float32)
    mask_ratio = 0.5

    out = jax.block_until_ready(masking_pallas(x, mask_ratio=mask_ratio, seed=0))

    # Structural checks: same shape/dtype, finite, every element either passed
    # through untouched or exactly zeroed.
    assert out.shape == x.shape and out.dtype == x.dtype, (out.shape, out.dtype)
    assert bool(jnp.all(jnp.isfinite(out)))
    assert bool(jnp.all((out == x) | (out == 0.0)))

    # Statistical check: kept fraction ~ (1 - mask_ratio) over 2048 elements.
    keep_frac = float(jnp.mean((out != 0.0).astype(jnp.float32)))
    assert abs(keep_frac - (1.0 - mask_ratio)) < 0.1, keep_frac

    # Determinism: same seed -> identical mask.
    out2 = jax.block_until_ready(masking_pallas(x, mask_ratio=mask_ratio, seed=0))
    assert bool(jnp.all(out == out2))

    print("KERNEL_OK")
</pallas_src>

<mosaic_0001>
module attributes {stable_mosaic.version = 11 : i64} {
  func.func @_masking_kernel(%arg0: i32, %arg1: memref<1xi32, #tpu.memory_space<smem>>, %arg2: memref<8x128xf32, #tpu.memory_space<vmem>>, %arg3: memref<8x128xf32, #tpu.memory_space<vmem>>) attributes {dimension_semantics = [#tpu.dimension_semantics<parallel>], iteration_bounds = array<i64: 2>, scalar_prefetch = 1 : i64, scratch_operands = 0 : i64, tpu.core_type = #tpu.core_type<tc>, window_params = [{transform_indices = @transform_0, window_bounds = array<i64: 8, 128>}, {transform_indices = @transform_1, window_bounds = array<i64: 8, 128>}]} {
    %c8_i32 = arith.constant 8 : i32
    %0 = arith.muli %arg0, %c8_i32 : i32
    %1 = tpu.iota {dimensions = array<i32: 0>} : vector<8x128xi32>
    %2 = vector.broadcast %0 : i32 to vector<8x128xi32>
    %3 = arith.addi %1, %2 : vector<8x128xi32>
    %4 = tpu.iota {dimensions = array<i32: 1>} : vector<8x128xi32>
    %c128_i32 = arith.constant 128 : i32
    %5 = vector.broadcast %c128_i32 : i32 to vector<8x128xi32>
    %6 = arith.muli %3, %5 : vector<8x128xi32>
    %7 = arith.addi %6, %4 : vector<8x128xi32>
    %c-1640531527_i32 = arith.constant -1640531527 : i32
    %8 = vector.broadcast %c-1640531527_i32 : i32 to vector<8x128xi32>
    %9 = arith.muli %7, %8 : vector<8x128xi32>
    %c0 = arith.constant 0 : index
    %10 = memref.load %arg1[%c0] : memref<1xi32, #tpu.memory_space<smem>>
    %11 = vector.broadcast %10 : i32 to vector<8x128xi32>
    %12 = arith.addi %9, %11 : vector<8x128xi32>
    %c16_i32 = arith.constant 16 : i32
    %13 = vector.broadcast %c16_i32 : i32 to vector<8x128xi32>
    %14 = arith.shrsi %12, %13 : vector<8x128xi32>
    %c65535_i32 = arith.constant 65535 : i32
    %15 = vector.broadcast %c65535_i32 : i32 to vector<8x128xi32>
    %16 = arith.andi %14, %15 : vector<8x128xi32>
    %17 = arith.xori %12, %16 : vector<8x128xi32>
    %c-2048144789_i32 = arith.constant -2048144789 : i32
    %18 = vector.broadcast %c-2048144789_i32 : i32 to vector<8x128xi32>
    %19 = arith.muli %17, %18 : vector<8x128xi32>
    %c13_i32 = arith.constant 13 : i32
    %20 = vector.broadcast %c13_i32 : i32 to vector<8x128xi32>
    %21 = arith.shrsi %19, %20 : vector<8x128xi32>
    %c524287_i32 = arith.constant 524287 : i32
    %22 = vector.broadcast %c524287_i32 : i32 to vector<8x128xi32>
    %23 = arith.andi %21, %22 : vector<8x128xi32>
    %24 = arith.xori %19, %23 : vector<8x128xi32>
    %c-1028477387_i32 = arith.constant -1028477387 : i32
    %25 = vector.broadcast %c-1028477387_i32 : i32 to vector<8x128xi32>
    %26 = arith.muli %24, %25 : vector<8x128xi32>
    %c16_i32_0 = arith.constant 16 : i32
    %27 = vector.broadcast %c16_i32_0 : i32 to vector<8x128xi32>
    %28 = arith.shrsi %26, %27 : vector<8x128xi32>
    %c65535_i32_1 = arith.constant 65535 : i32
    %29 = vector.broadcast %c65535_i32_1 : i32 to vector<8x128xi32>
    %30 = arith.andi %28, %29 : vector<8x128xi32>
    %31 = arith.xori %26, %30 : vector<8x128xi32>
    %c0_i32 = arith.constant 0 : i32
    %32 = vector.broadcast %c0_i32 : i32 to vector<8x128xi32>
    %33 = arith.cmpi sge, %31, %32 : vector<8x128xi32>
    %c0_2 = arith.constant 0 : index
    %c0_3 = arith.constant 0 : index
    %34 = vector.load %arg2[%c0_2, %c0_3] : memref<8x128xf32, #tpu.memory_space<vmem>>, vector<8x128xf32>
    %cst = arith.constant 0.000000e+00 : f32
    %35 = vector.broadcast %cst : f32 to vector<8x128xf32>
    %36 = arith.select %33, %34, %35 : vector<8x128xi1>, vector<8x128xf32>
    %c0_4 = arith.constant 0 : index
    %c0_5 = arith.constant 0 : index
    %37 = vector.load %arg3[%c0_4, %c0_5] : memref<8x128xf32, #tpu.memory_space<vmem>>, vector<8x128xf32>
    tpu.vector_store %arg3[%c0_4, %c0_5], %36 {strides = array<i32>} : memref<8x128xf32, #tpu.memory_space<vmem>>, vector<8x128xf32>,
    return
  }
  func.func @transform_0(%arg0: i32, %arg1: memref<1xi32, #tpu.memory_space<smem>>) -> (i32, i32) {
    %c0_i32 = arith.constant 0 : i32
    %c0_i32_0 = arith.constant 0 : i32
    return %arg0, %c0_i32 : i32, i32
  }
  func.func @transform_1(%arg0: i32, %arg1: memref<1xi32, #tpu.memory_space<smem>>) -> (i32, i32) {
    %c0_i32 = arith.constant 0 : i32
    %c0_i32_0 = arith.constant 0 : i32
    return %arg0, %c0_i32 : i32, i32
  }
}

</mosaic_0001>

<bundles_post_ra>
// kernel: tpu_custom_call.1
= control target key start
LH: loop header
LB: loop body
LE: loop exit
PB: predicated region body
PF: predicated region fallthrough
CT: control target
= control target key end

     0   :  { %s570_s0 = inlined_call_operand.<no memory space> [shape: s32[1], index: 0, kind: input, shape index: {}]   ;;  %s571_s1 = inlined_call_operand.hbm [shape: f32[16,128], index: 1, kind: input, shape index: {}]   ;;  %s572_s2 = inlined_call_operand.hbm [shape: f32[16,128], index: 2, kind: output, shape index: {}]  }
   0x1   :  { %7 = sst [smem:[#allocation3]] %s570_s0 }
   0x2   :  { %8 = vsyncpa [#allocation5], 0 }
   0x3   :  { %10 = vsyncpa [#allocation5 + $0x1], 0 }
   0x4   :  { %11 = vsyncpa [#allocation6], 0 }
   0x5   :  { %13 = vsyncpa [#allocation6 + $0x1], 0  ;;  %s422_s11 = smov 0   ;;  %s424_s12 = smov 0  }
   0x6   :  { %s426_s13 = smov 0   ;;  %s428_s14 = smov 0  }
   0x7 LB: > { %s443_s0 = sadd.s32 4294967295, %s400_s14   ;;  %s246_s15 = sadd.s32 4294967294, %s400_s14   ;;  %s400_s14 = sphi %s428_s14, %s589_s14   ;;  %s396_s13 = sphi %s426_s13, %s588_s13   ;;  %s392_s12 = sphi %s424_s12, %s587_s12   ;;  %s388_s11 = sphi %s422_s11, %s586_s11  }
   0x8   : > { %s447_s16 = sadd.s32 1, %s400_s14   ;;  %s26_s17 = sadd.s32 1, %s396_s13 }
   0x9   : > { %s23_s18 = ssub.s32 %s400_s14, %s447_s16  ;;  %p33_p0 = scmp.ne.s32.totalorder %s396_s13, %s392_s12 }
   0xa   : > { %p24_p1 = scmp.eq.s32.totalorder %s23_s18, 0  ;;  %p34_p2 = scmp.eq.s32.totalorder %s400_s14, 0 }
   0xb   : > { %p39_p3 = scmp.ne.s32.totalorder %s392_s12, %s388_s11  ;;  %p40_p4 = scmp.eq.s32.totalorder %s443_s0, 0 }
   0xc   : > { %s459_s19 = scalar_select %p24_p1, %s396_s13, %s26_s17  }
   0xd   : > { %p461_p5 = por %p34_p2, %p33_p0  ;;  %p465_p6 = por %p40_p4, %p39_p3 }
   0xe   : > { %p63_p7 = scmp.eq.s32.totalorder %s443_s0, 1  ;;  %p69_p8 = scmp.eq.s32.totalorder %s246_s15, 1 }
   0xf   : > { %s576_s21 = scalar_select %p465_p6, 1, 0 }
  0x10   : > { %p274_p10 = scmp.lt.s32.totalorder %s400_s14, 2  ;;  %p472_p11 = por %p63_p7, %p33_p0 }
  0x11   : > { %p476_p12 = por %p69_p8, %p39_p3  ;;  %s89_s24 = sand.u32 1, %s396_s13  }
  0x12   : > { %s577_s22 = scalar_select %p472_p11, 1, 0 }
  0x13   : > { %s578_s23 = scalar_select %p476_p12, 1, 0 }
  0x14   : > { %s250_s25 = sshll.u32 %s400_s14, 7  ;;  %s249_s26 = sshll.u32 %s89_s24, 3 }
  0x15   : > { %s485_s29 = scalar_lea.hbm %s571_s1, %s250_s25  ;;  %s93_s30 = scalar_lea.vmem [#allocation4], %s249_s26 }
  0x16   : > { %s100_s3 = sshll.u32 %s93_s30, 4  ;;  %p489_p13 = pnand %p274_p10, %p461_p5  ;;  %s493_s3 = int_to_ptr.vmem [resolvable:$true] %s100_s3 }
  0x17   : > { %s90_s5 = scalar_lea.sflag [#allocation5], %s89_s24  ;;  %s308_s6 = scalar_lea.hbm %s485_s29, 128 }
  0x18   : > { %p309_p2 = scmp.ne.s32.totalorder %s485_s29, %s308_s6  ;;  %p310_p3 = pneg %p489_p13 }
  0x19   : > { %s313_s9 = scalar_lea.hbm %s571_s1, 256  ;;  %p314_p5 = scmp.lt.s32.totalorder %s485_s29, %s571_s1 }
  0x1a   : > { %p311_p4 = pnand %p310_p3, %p309_p2  ;;  %p315_p8 = scmp.lt.s32.totalorder %s313_s9, %s308_s6 }
  0x1c   : > { %p312_p7 = pneg %p311_p4  ;;  %p316_p10 = por %p315_p8, %p314_p5 }
  0x1e   : > { %p317_p9 = pnand %p316_p10, %p312_p7 }
  0x20   : > { %320 = shalt.err (!%p317_p9)
}
  0x21   : > { %s321_s17 = scalar_lea.vmem %s493_s3, 128  ;;  %s402_s18 = smov [#allocation4]  }
  0x22   : > { %p322_p0 = scmp.ne.s32.totalorder %s493_s3, %s321_s17  ;;  %s326_s20 = sshll.u32 %s402_s18, 4  ;;  %s327_s20 = int_to_ptr.vmem [resolvable:$false] %s326_s20 }
  0x23   : > { %s328_s24 = scalar_lea.vmem %s327_s20, 256  ;;  %p329_p4 = scmp.lt.s32.totalorder %s493_s3, %s327_s20 }
  0x24   : > { %p324_p1 = pnand %p322_p0, %p310_p3  ;;  %p330_p12 = scmp.lt.s32.totalorder %s328_s24, %s321_s17 }
  0x26   : > { %p325_p2 = pneg %p324_p1  ;;  %p331_p11 = por %p330_p12, %p329_p4 }
  0x28   : > { %p332_p6 = pnand %p331_p11, %p325_p2 }
  0x2a   : > { %335 = shalt.err (!%p332_p6)
}
  0x2b   : > { %269 = dma.hbm_to_vmem [thread:$0]  (!%p489_p13), %s485_s29, 128, %s493_s3, %s90_s5  }
  0x2c   : > { %p580_p9 = scmp.lt.s32.totalorder %s400_s14, 3  ;;  %p581_p7 = scmp.ge.s32.totalorder %s400_s14, 1 }
  0x2e   : > { %p106_p0 = pnand %p581_p7, %p580_p9 }
  0x2f   : > { %s520_s25 = sand.u32 (!%p106_p0), 1, %s392_s12   ;;  %p582_p6 = scmp.ne.s32.totalorder (!%p106_p0), %s576_s21, 0 }
  0x30   : > { %109 = sbr.rel (%p106_p0) target bundleno = 99 (0x63), region = 24  ;;  %s252_s26 = sshll.u32 (!%p106_p0), %s520_s25, 3 }
  0x31   : > { %s112_s27 = scalar_lea.sflag (!%p106_p0), [#allocation5], %s520_s25  ;;  %s115_s28 = scalar_lea.vmem (!%p106_p0), [#allocation4], %s252_s26 }
  0x35   : > { %379 = dma.done.wait (%p582_p6), %s112_s27, 128  }
  0x36   : > { %381 = vsyncadd (%p582_p6), %s112_s27, 4294967168  ;;  %s254_s29 = sshll.u32 %s443_s0, 3  ;;  %v135_v0 = vlaneseq  ;;  %s144_s30 = sld [smem:[#allocation3]]  ;;  %v159_v18 = vld [vmem:[%s115_s28] sm:$0xff] }
  0x37   : > { %v137_v1 = vstv %s254_s29  ;;  %s133_s21 = scalar_lea.vmem [#allocation7], %s252_s26  ;;  %s259_s4 = sshll.u32 %s443_s0, 7 }
  0x38   : > { %v136_v2 = vshrl.u32 %v135_v0, 7  ;;  %v140_v4 = vand.u32 127, %v135_v0  ;;  %s176_s3 = sshll.u32 %s133_s21, 4  ;;  %s174_s7 = scalar_lea.hbm %s572_s2, %s259_s4  ;;  %s530_s3 = int_to_ptr.vmem [resolvable:$true] %s176_s3 }
  0x39   : > { %s163_s8 = scalar_lea.sflag [#allocation6], %s520_s25  ;;  %s336_s9 = scalar_lea.vmem %s530_s3, 128 }
  0x3a   : > { %v138_v3 = vadd.s32 %v137_v1, %v136_v2  ;;  %p337_p11 = scmp.ne.s32.totalorder %s530_s3, %s336_s9  ;;  %p583_p12 = scmp.ne.s32.totalorder %s577_s22, 0 }
  0x3b   : > { %s403_s0 = smov [#allocation7]  }
  0x3c   : > { %v141_v5 = vmul.u32 128, %v138_v3  ;;  %v145_v7 = vstv %s144_s30  ;;  %p338_p13 = pnand %p337_p11, %p583_p12  ;;  %s340_s10 = sshll.u32 %s403_s0, 4  ;;  %s341_s10 = int_to_ptr.vmem [resolvable:$false] %s340_s10 }
  0x3d   : > { %s342_s15 = scalar_lea.vmem %s341_s10, 256  ;;  %p343_p3 = scmp.lt.s32.totalorder %s530_s3, %s341_s10 }
  0x3e   : > { %v142_v6 = vadd.s32 %v141_v5, %v140_v4  ;;  %p339_p1 = pneg %p338_p13  ;;  %p344_p5 = scmp.lt.s32.totalorder %s342_s15, %s336_s9 }
  0x40   : > { %v143_v8 = vmul.u32 2654435769, %v142_v6  ;;  %p345_p8 = por %p344_p5, %p343_p3 }
  0x42   : > { %v146_v9 = vadd.s32 %v145_v7, %v143_v8  ;;  %p346_p10 = pnand %p345_p8, %p339_p1 }
  0x44   : > { %v255_v10 = vshrl.u32 %v146_v9, 16 }
  0x46   : > { %v149_v11 = vxor.u32 %v255_v10, %v146_v9 }
  0x48   : > { %v150_v12 = vmul.u32 2246822507, %v149_v11 }
  0x4a   : > { %v256_v13 = vshrl.u32 %v150_v12, 13 }
  0x4c   : > { %v153_v14 = vxor.u32 %v256_v13, %v150_v12 }
  0x4e   : > { %v154_v15 = vmul.u32 3266489909, %v153_v14 }
  0x50   : > { %v257_v16 = vshrl.u32 %v154_v15, 16 }
  0x52   : > { %v157_v17 = vxor.u32 %v257_v16, %v154_v15 }
  0x54   : > { %vm158_vm0 = vcmp.ge.s32.totalorder %v157_v17, 0 }
  0x55   : > { %v160_v19 = vsel %vm158_vm0, %v159_v18, 0.0 }
  0x56   : > { %161 = vst [vmem:[%s133_s21] sm:$0xff] %v160_v19 }
  0x57   : > { %349 = shalt.err (!%p346_p10)
}
  0x58   : > { %s350_s17 = scalar_lea.hbm %s174_s7, 128  ;;  %s354_s24 = scalar_lea.hbm %s572_s2, 256 }
  0x59   : > { %p351_p2 = scmp.ne.s32.totalorder %s174_s7, %s350_s17  ;;  %p355_p7 = scmp.lt.s32.totalorder %s174_s7, %s572_s2 }
  0x5a   : > { %p356_p0 = scmp.lt.s32.totalorder %s354_s24, %s350_s17 }
  0x5b   : > { %p352_p4 = pnand %p351_p2, %p583_p12 }
  0x5c   : > { %p357_p6 = por %p356_p0, %p355_p7 }
  0x5d   : > { %p353_p9 = pneg %p352_p4 }
  0x5f   : > { %p358_p11 = pnand %p357_p6, %p353_p9 }
  0x61   : > { %361 = shalt.err (!%p358_p11)
}
  0x62   : > { %264 = dma.vmem_to_hbm [thread:$0]  (%p583_p12), %s530_s3, 128, %s174_s7, %s163_s8  }
  0x63 PF: > { %s188_s27 = sand.u32 1, %s388_s11   ;;  %p584_p13 = scmp.ne.s32.totalorder %s578_s23, 0 }
  0x64   : > { %p585_p1 = scmp.ge.s32.totalorder %s400_s14, 2  ;;  %s189_s28 = scalar_lea.sflag [#allocation6], %s188_s27 }
  0x66   : > { %p271_p3 = pnand %p585_p1, %p584_p13 }
  0x68   : > { %p272_p5 = pneg %p271_p3 }
  0x6a   : > { %383 = dma.done.wait (%p272_p5), %s189_s28, 128  }
  0x6b   : > { %385 = vsyncadd (%p272_p5), %s189_s28, 4294967168  ;;  %p16_p8 = scmp.ge.s32.totalorder %s447_s16, 4   ;;  %s586_s11 = smov %s392_s12 }
  0x6c   : > { %s587_s12 = smov %s396_s13  ;;  %s588_s13 = smov %s459_s19 }
  0x6d   : > { %s589_s14 = smov %s447_s16  ;;  %18 = sbr.rel (!%p16_p8) target bundleno = 7 (0x7), region = 69 }
  0x72   :  { %194 = vsyncpa [#allocation5], 1 }
  0x73   :  { %196 = vsyncpa [#allocation5 + $0x1], 1 }
  0x74   :  { %197 = vsyncpa [#allocation6], 1 }
  0x75   :  { %199 = vsyncpa [#allocation6 + $0x1], 1 }

</bundles_post_ra>
